<compile_context>
chip_gen: v7x
topology: tpu7x:2x2x1
jax: 0.10.0
libtpu: 0.0.40
codegen_flags: <defaults>
</compile_context>

<pallas_src>
import functools

import jax
import jax.numpy as jnp
from jax.experimental import pallas as pl
from jax.experimental.pallas import tpu as pltpu

BN_EPS = 1e-5


def _round_up(n, m):
    return ((n + m - 1) // m) * m


def classblock_kernel(x_ref, w1_ref, b1_ref, w2_ref, b2_ref, out_ref):
    # ---- add_block: Linear (BN already folded into w1/b1) ----
    h = jnp.dot(x_ref[...], w1_ref[...], preferred_element_type=jnp.float32)
    h = h + b1_ref[...]                                   # (TB, Hp) + (1, Hp), f32
    # (relu=False -> no LeakyReLU; Dropout is identity in eval mode)

    # ---- classifier: Linear ----
    o = jnp.dot(h.astype(jnp.bfloat16), w2_ref[...],
                preferred_element_type=jnp.float32)
    out_ref[...] = o + b2_ref[...]                        # (TB, Cp) + (1, Cp), f32


def class_block_forward(x, params, *, tb=256):
    """x: (B, input_dim) float32. params: dict of f32 weights. Returns (B, class_num) f32."""
    B, D = x.shape
    H = params["w1"].shape[1]
    C = params["w2"].shape[1]

    # ---- fold BatchNorm1d (inference) + b1 into the first Linear (exact) ----
    scale = params["gamma"] * jax.lax.rsqrt(params["running_var"] + BN_EPS)   # (1, H)
    w1f = params["w1"] * scale                                                # (D, H)
    b1f = (params["b1"] - params["running_mean"]) * scale + params["beta"]    # (1, H)
    w2 = params["w2"]
    b2 = params["b2"]

    # ---- pad to lane/sublane friendly shapes (zeros are exact for matmul) ----
    Dp = _round_up(D, 128)
    Hp = _round_up(H, 128)
    Cp = _round_up(C, 128)
    TB = min(tb, _round_up(B, 8))
    Bp = _round_up(B, TB)

    x_p = jnp.pad(x, ((0, Bp - B), (0, Dp - D))).astype(jnp.bfloat16)
    w1_p = jnp.pad(w1f, ((0, Dp - D), (0, Hp - H))).astype(jnp.bfloat16)
    b1_p = jnp.pad(b1f, ((0, 0), (0, Hp - H)))                      # f32
    w2_p = jnp.pad(w2, ((0, Hp - H), (0, Cp - C))).astype(jnp.bfloat16)
    b2_p = jnp.pad(b2, ((0, 0), (0, Cp - C)))                       # f32

    # ---- VMEM budget: 2x-buffered x/out tiles + resident weights + headroom ----
    vmem_bytes = (
        2 * TB * Dp * 2            # x tile, bf16, double-buffered
        + 2 * TB * Cp * 4          # out tile, f32, double-buffered
        + 2 * Dp * Hp * 2          # w1 (bf16)
        + 2 * Hp * Cp * 2          # w2 (bf16)
        + 2 * (Hp + Cp) * 4        # biases (f32)
        + (4 << 20)                # headroom
    )
    vmem_limit = int(min(max(vmem_bytes, 16 << 20), 64 << 20))

    grid = (Bp // TB,)
    out_p = pl.pallas_call(
        classblock_kernel,
        out_shape=jax.ShapeDtypeStruct((Bp, Cp), jnp.float32),
        grid=grid,
        in_specs=[
            pl.BlockSpec((TB, Dp), lambda i: (i, 0)),   # x tile, streamed over batch
            pl.BlockSpec((Dp, Hp), lambda i: (0, 0)),   # w1 resident
            pl.BlockSpec((1, Hp), lambda i: (0, 0)),    # b1 resident
            pl.BlockSpec((Hp, Cp), lambda i: (0, 0)),   # w2 resident
            pl.BlockSpec((1, Cp), lambda i: (0, 0)),    # b2 resident
        ],
        out_specs=pl.BlockSpec((TB, Cp), lambda i: (i, 0)),
        compiler_params=pltpu.CompilerParams(
            dimension_semantics=("parallel",),
            vmem_limit_bytes=vmem_limit,
        ),
    )(x_p, w1_p, b1_p, w2_p, b2_p)

    return out_p[:B, :C]


def init_params(key, input_dim, num_bottleneck, class_num):
    k1, k2, k3 = jax.random.split(key, 3)
    # Linear (add_block): kaiming_normal_(mode='fan_out') -> std = sqrt(2 / fan_out)
    std1 = (2.0 / num_bottleneck) ** 0.5
    w1 = std1 * jax.random.normal(k1, (input_dim, num_bottleneck), jnp.float32)
    b1 = jnp.zeros((1, num_bottleneck), jnp.float32)
    # BatchNorm1d: weight ~ N(1.0, 0.02), bias = 0; running stats at init
    gamma = 1.0 + 0.02 * jax.random.normal(k2, (1, num_bottleneck), jnp.float32)
    beta = jnp.zeros((1, num_bottleneck), jnp.float32)
    running_mean = jnp.zeros((1, num_bottleneck), jnp.float32)
    running_var = jnp.ones((1, num_bottleneck), jnp.float32)
    # classifier Linear: weight ~ N(0, 0.001), bias = 0
    w2 = 0.001 * jax.random.normal(k3, (num_bottleneck, class_num), jnp.float32)
    b2 = jnp.zeros((1, class_num), jnp.float32)
    return dict(w1=w1, b1=b1, gamma=gamma, beta=beta,
                running_mean=running_mean, running_var=running_var,
                w2=w2, b2=b2)


if __name__ == "__main__":
    key = jax.random.PRNGKey(0)
    kx, kp = jax.random.split(key)

    # small shapes consistent with the module (input_dim -> bottleneck -> class_num)
    batch, input_dim, num_bottleneck, class_num = 8, 64, 32, 16
    x = jax.random.normal(kx, (batch, input_dim), jnp.float32)
    params = init_params(kp, input_dim, num_bottleneck, class_num)

    fwd = jax.jit(functools.partial(class_block_forward, tb=256))
    out = fwd(x, params)
    jax.block_until_ready(out)

    # sanity check against plain-JAX reference (original unfused f32 semantics).
    # Kernel uses bf16 matmul operands with f32 accumulation -> loose tolerance.
    h_ref = x @ params["w1"] + params["b1"]
    h_ref = (h_ref - params["running_mean"]) * jax.lax.rsqrt(
        params["running_var"] + BN_EPS) * params["gamma"] + params["beta"]
    out_ref = h_ref @ params["w2"] + params["b2"]
    assert out.shape == (batch, class_num)
    assert jnp.allclose(out, out_ref, atol=1e-3, rtol=5e-2), (
        float(jnp.max(jnp.abs(out - out_ref))))

    print("KERNEL_OK")
</pallas_src>

<mosaic_0001>
module attributes {stable_mosaic.version = 11 : i64} {
  func.func @classblock_kernel(%arg0: i32, %arg1: memref<8x128xbf16, #tpu.memory_space<vmem>>, %arg2: memref<128x128xbf16, #tpu.memory_space<vmem>>, %arg3: memref<1x128xf32, #tpu.memory_space<vmem>>, %arg4: memref<128x128xbf16, #tpu.memory_space<vmem>>, %arg5: memref<1x128xf32, #tpu.memory_space<vmem>>, %arg6: memref<8x128xf32, #tpu.memory_space<vmem>>) attributes {dimension_semantics = [#tpu.dimension_semantics<parallel>], iteration_bounds = array<i64: 1>, scalar_prefetch = 0 : i64, scratch_operands = 0 : i64, tpu.core_type = #tpu.core_type<tc>, window_params = [{transform_indices = @transform_0, window_bounds = array<i64: 8, 128>}, {pipeline_mode = #tpu.pipeline_mode<synchronous>, transform_indices = @transform_1, window_bounds = array<i64: 128, 128>}, {pipeline_mode = #tpu.pipeline_mode<synchronous>, transform_indices = @transform_2, window_bounds = array<i64: 1, 128>}, {pipeline_mode = #tpu.pipeline_mode<synchronous>, transform_indices = @transform_3, window_bounds = array<i64: 128, 128>}, {pipeline_mode = #tpu.pipeline_mode<synchronous>, transform_indices = @transform_4, window_bounds = array<i64: 1, 128>}, {transform_indices = @transform_5, window_bounds = array<i64: 8, 128>}]} {
    %c0 = arith.constant 0 : index
    %c0_0 = arith.constant 0 : index
    %0 = vector.load %arg1[%c0, %c0_0] : memref<8x128xbf16, #tpu.memory_space<vmem>>, vector<8x128xbf16>
    %c0_1 = arith.constant 0 : index
    %c0_2 = arith.constant 0 : index
    %1 = vector.load %arg2[%c0_1, %c0_2] : memref<128x128xbf16, #tpu.memory_space<vmem>>, vector<128x128xbf16>
    %cst = arith.constant dense<0.000000e+00> : vector<8x128xf32>
    %2 = tpu.matmul %0, %1, %cst {dimension_numbers = #tpu.dot_dimension_numbers<[1], [0], [0], [1], [0, 0, 1, 1], [], []>} : vector<8x128xbf16>, vector<128x128xbf16>, vector<8x128xf32> -> vector<8x128xf32>
    %c0_3 = arith.constant 0 : index
    %c0_4 = arith.constant 0 : index
    %3 = vector.load %arg3[%c0_3, %c0_4] : memref<1x128xf32, #tpu.memory_space<vmem>>, vector<1x128xf32>
    %4 = vector.broadcast %3 : vector<1x128xf32> to vector<8x128xf32>
    %5 = arith.addf %2, %4 : vector<8x128xf32>
    %6 = arith.truncf %5 : vector<8x128xf32> to vector<8x128xbf16>
    %c0_5 = arith.constant 0 : index
    %c0_6 = arith.constant 0 : index
    %7 = vector.load %arg4[%c0_5, %c0_6] : memref<128x128xbf16, #tpu.memory_space<vmem>>, vector<128x128xbf16>
    %cst_7 = arith.constant dense<0.000000e+00> : vector<8x128xf32>
    %8 = tpu.matmul %6, %7, %cst_7 {dimension_numbers = #tpu.dot_dimension_numbers<[1], [0], [0], [1], [0, 0, 1, 1], [], []>} : vector<8x128xbf16>, vector<128x128xbf16>, vector<8x128xf32> -> vector<8x128xf32>
    %c0_8 = arith.constant 0 : index
    %c0_9 = arith.constant 0 : index
    %9 = vector.load %arg5[%c0_8, %c0_9] : memref<1x128xf32, #tpu.memory_space<vmem>>, vector<1x128xf32>
    %10 = vector.broadcast %9 : vector<1x128xf32> to vector<8x128xf32>
    %11 = arith.addf %8, %10 : vector<8x128xf32>
    %c0_10 = arith.constant 0 : index
    %c0_11 = arith.constant 0 : index
    %12 = vector.load %arg6[%c0_10, %c0_11] : memref<8x128xf32, #tpu.memory_space<vmem>>, vector<8x128xf32>
    tpu.vector_store %arg6[%c0_10, %c0_11], %11 {strides = array<i32>} : memref<8x128xf32, #tpu.memory_space<vmem>>, vector<8x128xf32>,
    return
  }
  func.func @transform_0(%arg0: i32) -> (i32, i32) {
    %c0_i32 = arith.constant 0 : i32
    %c0_i32_0 = arith.constant 0 : i32
    return %arg0, %c0_i32 : i32, i32
  }
  func.func @transform_1(%arg0: i32) -> (i32, i32) {
    %c0_i32 = arith.constant 0 : i32
    %c0_i32_0 = arith.constant 0 : i32
    %c0_i32_1 = arith.constant 0 : i32
    return %c0_i32, %c0_i32_0 : i32, i32
  }
  func.func @transform_2(%arg0: i32) -> (i32, i32) {
    %c0_i32 = arith.constant 0 : i32
    %c0_i32_0 = arith.constant 0 : i32
    %c0_i32_1 = arith.constant 0 : i32
    return %c0_i32, %c0_i32_0 : i32, i32
  }
  func.func @transform_3(%arg0: i32) -> (i32, i32) {
    %c0_i32 = arith.constant 0 : i32
    %c0_i32_0 = arith.constant 0 : i32
    %c0_i32_1 = arith.constant 0 : i32
    return %c0_i32, %c0_i32_0 : i32, i32
  }
  func.func @transform_4(%arg0: i32) -> (i32, i32) {
    %c0_i32 = arith.constant 0 : i32
    %c0_i32_0 = arith.constant 0 : i32
    %c0_i32_1 = arith.constant 0 : i32
    return %c0_i32, %c0_i32_0 : i32, i32
  }
  func.func @transform_5(%arg0: i32) -> (i32, i32) {
    %c0_i32 = arith.constant 0 : i32
    %c0_i32_0 = arith.constant 0 : i32
    return %arg0, %c0_i32 : i32, i32
  }
}

</mosaic_0001>

<bundles_post_ra>
// kernel: class_block_forward.1
= control target key start
LH: loop header
LB: loop body
LE: loop exit
PB: predicated region body
PF: predicated region fallthrough
CT: control target
= control target key end

     0   :  { %v380_v1 = vmov 0.0   ;;  %vm381_vm0 = vmmov 0   ;;  %s482_s0 = inlined_call_operand.vmem [shape: bf16[8,128], index: 0, kind: input, shape index: {}]   ;;  %s483_s1 = inlined_call_operand.vmem [shape: bf16[128,128], index: 1, kind: input, shape index: {}]   ;;  %s484_s2 = inlined_call_operand.vmem [shape: f32[1,128], index: 2, kind: input, shape index: {}]   ;;  %s485_s3 = inlined_call_operand.vmem [shape: bf16[128,128], index: 3, kind: input, shape index: {}]   ;;  %s486_s4 = inlined_call_operand.vmem [shape: f32[1,128], index: 4, kind: input, shape index: {}]   ;;  %s487_s5 = inlined_call_operand.hbm [shape: f32[8,128], index: 5, kind: output, shape index: {}]  }
   0x1   :  { %v340_v0 = vld [vmem:[%s483_s1] sm:$0xff]   ;;  %297 = vmatprep.subr.bf16.mxu0 %v380_v1  ;;  %317 = vmatprep.subr.bf16.mxu1 %v380_v1  ;;  %v341_v2 = vld [vmem:[%s483_s1 + $0x8] sm:$0xff]   ;;  %v342_v3 = vld [vmem:[%s483_s1 + $0x10] sm:$0xff]  }
   0x2   :  { %298 = vmatpush3.bf16.msra.mxu0 %v340_v0  ;;  %313 = vmatprep.mubr.msk.bf16.mxu0 %vm381_vm0, %v380_v1  ;;  %v348_v4 = vld [vmem:[%s485_s3] sm:$0xff]   ;;  %v343_v5 = vld [vmem:[%s483_s1 + $0x18] sm:$0xff]   ;;  %v349_v6 = vld [vmem:[%s485_s3 + $0x8] sm:$0xff]  }
   0x3   :  { %299 = vmatprep.subr.bf16.mxu0 %v380_v1  ;;  %333 = vmatprep.mubr.msk.bf16.mxu1 %vm381_vm0, %v380_v1  ;;  %v344_v7 = vld [vmem:[%s483_s1 + $0x20] sm:$0xff]   ;;  %v350_v8 = vld [vmem:[%s485_s3 + $0x10] sm:$0xff]  }
   0x4   :  { %318 = vmatpush3.bf16.msra.mxu1 %v348_v4 }
   0x5   :  { %319 = vmatprep.subr.bf16.mxu1 %v380_v1 }
   0x6   :  { %300 = vmatpush3.bf16.msra.mxu0 %v341_v2 }
   0x7   :  { %301 = vmatprep.subr.bf16.mxu0 %v380_v1 }
   0x8   :  { %320 = vmatpush3.bf16.msra.mxu1 %v349_v6 }
   0x9   :  { %321 = vmatprep.subr.bf16.mxu1 %v380_v1 }
   0xa   :  { %302 = vmatpush3.bf16.msra.mxu0 %v342_v3 }
   0xb   :  { %303 = vmatprep.subr.bf16.mxu0 %v380_v1 }
   0xe   :  { %304 = vmatpush3.bf16.msra.mxu0 %v343_v5 }
   0xf   :  { %305 = vmatprep.subr.bf16.mxu0 %v380_v1 }
  0x10   :  { %10 = vsyncpa [#allocation3], 0  ;;  %v345_v9 = vld [vmem:[%s483_s1 + $0x28] sm:$0xff]   ;;  %322 = vmatpush3.bf16.msra.mxu1 %v350_v8  ;;  %v351_v10 = vld [vmem:[%s485_s3 + $0x18] sm:$0xff]   ;;  %s382_s29 = smov [#allocation2]  }
  0x11   :  { %323 = vmatprep.subr.bf16.mxu1 %v380_v1  ;;  %v346_v11 = vld [vmem:[%s483_s1 + $0x30] sm:$0xff]   ;;  %v352_v12 = vld [vmem:[%s485_s3 + $0x20] sm:$0xff]   ;;  %v347_v13 = vld [vmem:[%s483_s1 + $0x38] sm:$0xff]   ;;  %s253_s30 = sshll.u32 %s382_s29, 4  ;;  %s254_s30 = int_to_ptr.vmem [resolvable:$true] %s253_s30 }
  0x12   :  { %306 = vmatpush3.bf16.msra.mxu0 %v344_v7  ;;  %v353_v14 = vld [vmem:[%s485_s3 + $0x28] sm:$0xff]   ;;  %v22_v15 = vld [vmem:[%s482_s0] sm:$0xf]  ;;  %v354_v16 = vld [vmem:[%s485_s3 + $0x30] sm:$0xff]   ;;  %p361_p1 = scmp.lt.s32.totalorder %s254_s30, %s254_s30 }
  0x13   :  { %307 = vmatprep.subr.bf16.mxu0 %v380_v1  ;;  %v355_v17 = vld [vmem:[%s485_s3 + $0x38] sm:$0xff]   ;;  %v261_v18 = vld [vmem:[%s484_s2] ss:$0 sm:$0xff]  ;;  %s356_s2 = scalar_lea.vmem %s254_s30, 128 }
  0x14   :  { %324 = vmatpush3.bf16.msra.mxu1 %v351_v10  ;;  %v270_v25 = vld [vmem:[%s486_s4] ss:$0 sm:$0xff]  ;;  %p357_p0 = scmp.ne.s32.totalorder %s254_s30, %s356_s2  ;;  %p362_p2 = scmp.lt.s32.totalorder %s356_s2, %s356_s2 }
  0x15   :  { %325 = vmatprep.subr.bf16.mxu1 %v380_v1 }
  0x16   :  { %308 = vmatpush3.bf16.msra.mxu0 %v345_v9  ;;  %p363_p3 = por %p362_p2, %p361_p1 }
  0x17   :  { %309 = vmatprep.subr.bf16.mxu0 %v380_v1 }
  0x18   :  { %326 = vmatpush3.bf16.msra.mxu1 %v352_v12  ;;  %p364_p4 = pnand %p363_p3, %p357_p0 }
  0x19   :  { %327 = vmatprep.subr.bf16.mxu1 %v380_v1 }
  0x1a   :  { %310 = vmatpush3.bf16.msra.mxu0 %v346_v11 }
  0x1b   :  { %311 = vmatprep.subr.bf16.mxu0 %v380_v1 }
  0x1c   :  { %328 = vmatpush3.bf16.msra.mxu1 %v353_v14 }
  0x1d   :  { %329 = vmatprep.subr.bf16.mxu1 %v380_v1 }
  0x1e   :  { %312 = vmatpush3.bf16.msra.mxu0 %v347_v13 }
  0x20   :  { %330 = vmatpush3.bf16.msra.mxu1 %v354_v16 }
  0x21   :  { %314 = vmatmul.mubr.bf16.vlgmr.msra.gmra.mrb[0].mxu0 %v22_v15  ;;  %331 = vmatprep.subr.bf16.mxu1 %v380_v1 }
  0x24   :  { %332 = vmatpush3.bf16.msra.mxu1 %v355_v17 }
  0xf4   :  { %v128_v19 = vpop.f32.mrb[0].mxu0 }
  0xf5   :  { %v129_v20 = vadd.f32 %v261_v18, %v128_v19  ;;  %v315_v21 = vpop.f32.mrb[1].mxu0 }
  0xf6   :  { %v131_v22 = vpop.f32.mrb[2].mxu0 }
  0xf7   :  { %v134_v23 = vpack.c.bf16 %v129_v20, %v129_v20  ;;  %v316_v24 = vpop.f32.mrb[3].mxu0 }
  0xf9   :  { %334 = vmatmul.mubr.bf16.vlgmr.msra.gmra.mrb[0].mxu1 %v134_v23 }
 0x1cc   :  { %v240_v26 = vpop.f32.mrb[0].mxu1 }
 0x1cd   :  { %v241_v27 = vadd.f32 %v270_v25, %v240_v26  ;;  %v335_v28 = vpop.f32.mrb[1].mxu1 }
 0x1ce   :  { %v243_v29 = vpop.f32.mrb[2].mxu1 }
 0x1cf   :  { %246 = vst [vmem:[#allocation2] sm:$0xff] %v241_v27  ;;  %v336_v30 = vpop.f32.mrb[3].mxu1 }
 0x1d0   :  { %367 = shalt.err (!%p364_p4)
}
 0x1d1   :  { %s368_s4 = scalar_lea.hbm %s487_s5, 128 }
 0x1d2   :  { %p369_p5 = scmp.ne.s32.totalorder %s487_s5, %s368_s4  ;;  %p372_p6 = scmp.lt.u32.totalorder %s368_s4, %s487_s5 }
 0x1d4   :  { %p374_p7 = pnand %p372_p6, %p369_p5 }
 0x1d6   :  { %377 = shalt.err (!%p374_p7)
}
 0x1d7   :  { %256 = dma.vmem_to_hbm [thread:$0]  %s254_s30, 128, %s487_s5, [#allocation3]  }
 0x1d8   :  { %378 = dma.done.wait [#allocation3], 128  }
 0x1d9   :  { %379 = vsyncadd [#allocation3], 4294967168 }
 0x1da   :  { %260 = vsyncpa [#allocation3], 1 }

</bundles_post_ra>
